<compile_context>
chip_gen: v7x
topology: tpu7x:2x2x1
jax: 0.10.0
libtpu: 0.0.40
codegen_flags: <defaults>
</compile_context>

<pallas_src>
import math
import functools

import jax
import jax.numpy as jnp
from jax import lax
from jax.experimental import pallas as pl
from jax.experimental.pallas import tpu as pltpu


VMEM_LIMIT_BYTES = 32 * 1024 * 1024  # safe on v5e/v6e (128 MiB) and v7x (64 MiB)


# --------------------------------------------------------------------------
# 1) QKV projection: one grid step = one (batch, head).
# --------------------------------------------------------------------------
def _qkv_proj_kernel(x_ref, wq_ref, wk_ref, wv_ref, bq_ref, bk_ref, bv_ref,
                     q_ref, k_ref, v_ref):
    x = x_ref[0]                                   # (T, C), bf16
    q = jnp.dot(x, wq_ref[0], preferred_element_type=jnp.float32) + bq_ref[0]
    k = jnp.dot(x, wk_ref[0], preferred_element_type=jnp.float32) + bk_ref[0]
    v = jnp.dot(x, wv_ref[0], preferred_element_type=jnp.float32) + bv_ref[0]
    q_ref[0, 0] = q.astype(q_ref.dtype)
    k_ref[0, 0] = k.astype(k_ref.dtype)
    v_ref[0, 0] = v.astype(v_ref.dtype)


# --------------------------------------------------------------------------
# 2) Flash-style attention with online softmax (no mask, no dropout).
# --------------------------------------------------------------------------
def _flash_attn_kernel(q_ref, k_ref, v_ref, o_ref, m_sc, l_sc, acc_sc, *, scale):
    ki = pl.program_id(3)

    @pl.when(ki == 0)
    def _():
        m_sc[...] = jnp.full_like(m_sc, -jnp.inf)
        l_sc[...] = jnp.zeros_like(l_sc)
        acc_sc[...] = jnp.zeros_like(acc_sc)

    # Fold the 1/sqrt(hd) scale into q (touches T*hd, not T*T elements).
    q = (q_ref[0, 0] * scale).astype(jnp.bfloat16)          # (tq, hd)
    k = k_ref[0, 0]                                         # (tk, hd) bf16
    v = v_ref[0, 0]                                         # (tk, hd) bf16

    # q @ k^T on the MXU (contract head_dim of both), f32 accumulate.
    s = lax.dot_general(q, k, (((1,), (1,)), ((), ())),
                        preferred_element_type=jnp.float32)  # (tq, tk) f32

    m_prev = m_sc[...]
    m_new = jnp.maximum(m_prev, jnp.max(s, axis=-1, keepdims=True))
    alpha = jnp.exp(m_prev - m_new)                          # (tq, 1)
    p = jnp.exp(s - m_new)                                   # (tq, tk) f32

    l_sc[...] = alpha * l_sc[...] + jnp.sum(p, axis=-1, keepdims=True)
    acc_sc[...] = alpha * acc_sc[...] + jnp.dot(
        p.astype(jnp.bfloat16), v, preferred_element_type=jnp.float32)
    m_sc[...] = m_new

    @pl.when(ki == pl.num_programs(3) - 1)
    def _():
        # Normalize the (tq, hd) accumulator once (not the (tq, tk) probs).
        inv_l = pl.reciprocal(l_sc[...], approx=True)
        o_ref[0, 0] = (acc_sc[...] * inv_l).astype(o_ref.dtype)


# --------------------------------------------------------------------------
# 3) Output projection as an accumulation over heads.
# --------------------------------------------------------------------------
def _out_proj_kernel(y_ref, wp_ref, bp_ref, o_ref, acc_sc):
    h = pl.program_id(1)

    @pl.when(h == 0)
    def _():
        acc_sc[...] = jnp.zeros_like(acc_sc)

    acc_sc[...] += jnp.dot(y_ref[0, 0], wp_ref[0],
                           preferred_element_type=jnp.float32)   # (T, C) f32

    @pl.when(h == pl.num_programs(1) - 1)
    def _():
        o_ref[0] = (acc_sc[...] + bp_ref[...]).astype(o_ref.dtype)


# --------------------------------------------------------------------------
# Wrapper
# --------------------------------------------------------------------------
def causal_self_attention(x, w_attn, b_attn, w_proj, b_proj, *, n_head,
                          block_q=128, block_k=128):
    """x: (B, T, C).  Weights in PyTorch layout:
       w_attn: (3C, C), b_attn: (3C,), w_proj: (C, C), b_proj: (C,)."""
    B, T, C = x.shape
    assert C % n_head == 0
    H = n_head
    hd = C // H

    tq = min(block_q, T)
    tk = min(block_k, T)
    assert T % tq == 0 and T % tk == 0, "T must divide the q/kv tile sizes"
    nq, nk = T // tq, T // tk

    # --- parameter re-layout: PyTorch (out, in) -> per-head (in, out), bf16 ---
    w_attn_bf = w_attn.astype(jnp.bfloat16)
    wq = w_attn_bf[0 * C:1 * C].reshape(H, hd, C).transpose(0, 2, 1)   # (H, C, hd)
    wk = w_attn_bf[1 * C:2 * C].reshape(H, hd, C).transpose(0, 2, 1)
    wv = w_attn_bf[2 * C:3 * C].reshape(H, hd, C).transpose(0, 2, 1)
    bq = b_attn[0 * C:1 * C].reshape(H, 1, hd).astype(jnp.float32)
    bk = b_attn[1 * C:2 * C].reshape(H, 1, hd).astype(jnp.float32)
    bv = b_attn[2 * C:3 * C].reshape(H, 1, hd).astype(jnp.float32)
    wp = w_proj.T.reshape(H, hd, C).astype(jnp.bfloat16)               # (H, hd, C)
    bp = b_proj.reshape(1, C).astype(jnp.float32)

    x_bf = x.astype(jnp.bfloat16)

    # ---------------- 1) QKV projection -> (B, H, T, hd) q, k, v -------------
    qkv_out_spec = pl.BlockSpec((1, 1, T, hd), lambda b, h: (b, h, 0, 0))
    q, k, v = pl.pallas_call(
        _qkv_proj_kernel,
        out_shape=(jax.ShapeDtypeStruct((B, H, T, hd), jnp.bfloat16),) * 3,
        grid_spec=pltpu.PrefetchScalarGridSpec(
            num_scalar_prefetch=0,
            grid=(B, H),
            in_specs=[
                pl.BlockSpec((1, T, C), lambda b, h: (b, 0, 0)),       # x
                pl.BlockSpec((1, C, hd), lambda b, h: (h, 0, 0)),      # wq
                pl.BlockSpec((1, C, hd), lambda b, h: (h, 0, 0)),      # wk
                pl.BlockSpec((1, C, hd), lambda b, h: (h, 0, 0)),      # wv
                pl.BlockSpec((1, 1, hd), lambda b, h: (h, 0, 0)),      # bq
                pl.BlockSpec((1, 1, hd), lambda b, h: (h, 0, 0)),      # bk
                pl.BlockSpec((1, 1, hd), lambda b, h: (h, 0, 0)),      # bv
            ],
            out_specs=(qkv_out_spec,) * 3,
        ),
        compiler_params=pltpu.CompilerParams(
            dimension_semantics=("parallel", "parallel"),
            vmem_limit_bytes=VMEM_LIMIT_BYTES),
    )(x_bf, wq, wk, wv, bq, bk, bv)

    # ---------------- 2) flash attention -> y: (B, H, T, hd) -----------------
    scale = 1.0 / math.sqrt(hd)
    flash = functools.partial(_flash_attn_kernel, scale=scale)
    y = pl.pallas_call(
        flash,
        out_shape=jax.ShapeDtypeStruct((B, H, T, hd), jnp.bfloat16),
        grid_spec=pltpu.PrefetchScalarGridSpec(
            num_scalar_prefetch=0,
            grid=(B, H, nq, nk),
            in_specs=[
                pl.BlockSpec((1, 1, tq, hd), lambda b, h, qi, ki: (b, h, qi, 0)),
                pl.BlockSpec((1, 1, tk, hd), lambda b, h, qi, ki: (b, h, ki, 0)),
                pl.BlockSpec((1, 1, tk, hd), lambda b, h, qi, ki: (b, h, ki, 0)),
            ],
            out_specs=pl.BlockSpec((1, 1, tq, hd),
                                   lambda b, h, qi, ki: (b, h, qi, 0)),
            scratch_shapes=[
                pltpu.VMEM((tq, 1), jnp.float32),    # running max  m
                pltpu.VMEM((tq, 1), jnp.float32),    # running sum  l
                pltpu.VMEM((tq, hd), jnp.float32),   # output accumulator
            ],
        ),
        compiler_params=pltpu.CompilerParams(
            dimension_semantics=("parallel", "parallel", "parallel", "arbitrary"),
            vmem_limit_bytes=VMEM_LIMIT_BYTES),
        cost_estimate=pl.CostEstimate(
            flops=4 * B * H * T * T * hd,
            transcendentals=B * H * T * T,
            bytes_accessed=2 * 4 * B * H * T * hd),
    )(q, k, v)

    # ---------------- 3) output projection (accumulate over heads) -----------
    out = pl.pallas_call(
        _out_proj_kernel,
        out_shape=jax.ShapeDtypeStruct((B, T, C), x.dtype),
        grid_spec=pltpu.PrefetchScalarGridSpec(
            num_scalar_prefetch=0,
            grid=(B, H),
            in_specs=[
                pl.BlockSpec((1, 1, T, hd), lambda b, h: (b, h, 0, 0)),  # y
                pl.BlockSpec((1, hd, C), lambda b, h: (h, 0, 0)),        # wp
                pl.BlockSpec((1, C), lambda b, h: (0, 0)),               # bp
            ],
            out_specs=pl.BlockSpec((1, T, C), lambda b, h: (b, 0, 0)),
            scratch_shapes=[pltpu.VMEM((T, C), jnp.float32)],
        ),
        compiler_params=pltpu.CompilerParams(
            dimension_semantics=("parallel", "arbitrary"),
            vmem_limit_bytes=VMEM_LIMIT_BYTES),
    )(y, wp, bp)

    return out


# --------------------------------------------------------------------------
# Pure-JAX reference mirroring the PyTorch forward (f32 end to end).
# --------------------------------------------------------------------------
def _reference(x, w_attn, b_attn, w_proj, b_proj, n_head):
    B, T, C = x.shape
    hd = C // n_head
    qkv = x @ w_attn.T + b_attn
    q, k, v = jnp.split(qkv, 3, axis=-1)

    def heads(t):
        return t.reshape(B, T, n_head, hd).transpose(0, 2, 1, 3)

    q, k, v = heads(q), heads(k), heads(v)
    s = jnp.einsum("bhqd,bhkd->bhqk", q, k) / math.sqrt(hd)
    p = jax.nn.softmax(s, axis=-1)
    y = jnp.einsum("bhqk,bhkd->bhqd", p, v)
    y = y.transpose(0, 2, 1, 3).reshape(B, T, C)
    return y @ w_proj.T + b_proj


if __name__ == "__main__":
    # Small config: B=2, T(block/seq)=8, n_embd=32, n_head=4.
    # NOTE: at this toy size C < 128 so stores are masked/padded; real perf
    # behavior needs C, head_dim multiples of 128.
    B, T, C, n_head = 2, 8, 32, 4

    key = jax.random.PRNGKey(0)
    kx, kw1, kb1, kw2, kb2 = jax.random.split(key, 5)

    x = jax.random.normal(kx, (B, T, C), dtype=jnp.float32)

    # nn.Linear(C, 3C): weight (3C, C), bias (3C,)  -- PyTorch layout.
    bound1 = 1.0 / math.sqrt(C)
    w_attn = jax.random.uniform(kw1, (3 * C, C), jnp.float32, -bound1, bound1)
    b_attn = jax.random.uniform(kb1, (3 * C,), jnp.float32, -bound1, bound1)

    # nn.Linear(C, C): weight (C, C), bias (C,)  -- PyTorch layout.
    bound2 = 1.0 / math.sqrt(C)
    w_proj = jax.random.uniform(kw2, (C, C), jnp.float32, -bound2, bound2)
    b_proj = jax.random.uniform(kb2, (C,), jnp.float32, -bound2, bound2)

    out = causal_self_attention(x, w_attn, b_attn, w_proj, b_proj, n_head=n_head)
    out = jax.block_until_ready(out)

    ref = _reference(x, w_attn, b_attn, w_proj, b_proj, n_head)
    assert out.shape == (B, T, C)
    # bf16 MXU inputs + approx reciprocal -> loosened tolerance vs f32 reference.
    assert jnp.allclose(out, ref, atol=3e-2, rtol=3e-2), "mismatch vs JAX reference"

    print("KERNEL_OK")
</pallas_src>

<mosaic_0001>
module attributes {stable_mosaic.version = 11 : i64} {
  func.func @_qkv_proj_kernel(%arg0: i32, %arg1: i32, %arg2: memref<1x8x32xbf16, #tpu.memory_space<vmem>>, %arg3: memref<1x32x8xbf16, #tpu.memory_space<vmem>>, %arg4: memref<1x32x8xbf16, #tpu.memory_space<vmem>>, %arg5: memref<1x32x8xbf16, #tpu.memory_space<vmem>>, %arg6: memref<1x1x8xf32, #tpu.memory_space<vmem>>, %arg7: memref<1x1x8xf32, #tpu.memory_space<vmem>>, %arg8: memref<1x1x8xf32, #tpu.memory_space<vmem>>, %arg9: memref<1x1x8x8xbf16, #tpu.memory_space<vmem>>, %arg10: memref<1x1x8x8xbf16, #tpu.memory_space<vmem>>, %arg11: memref<1x1x8x8xbf16, #tpu.memory_space<vmem>>) attributes {dimension_semantics = [#tpu.dimension_semantics<parallel>, #tpu.dimension_semantics<parallel>], iteration_bounds = array<i64: 2, 4>, scalar_prefetch = 0 : i64, scratch_operands = 0 : i64, tpu.core_type = #tpu.core_type<tc>, window_params = [{transform_indices = @transform_0, window_bounds = array<i64: 1, 8, 32>}, {transform_indices = @transform_1, window_bounds = array<i64: 1, 32, 8>}, {transform_indices = @transform_2, window_bounds = array<i64: 1, 32, 8>}, {transform_indices = @transform_3, window_bounds = array<i64: 1, 32, 8>}, {transform_indices = @transform_4, window_bounds = array<i64: 1, 1, 8>}, {transform_indices = @transform_5, window_bounds = array<i64: 1, 1, 8>}, {transform_indices = @transform_6, window_bounds = array<i64: 1, 1, 8>}, {transform_indices = @transform_7, window_bounds = array<i64: 1, 1, 8, 8>}, {transform_indices = @transform_8, window_bounds = array<i64: 1, 1, 8, 8>}, {transform_indices = @transform_9, window_bounds = array<i64: 1, 1, 8, 8>}]} {
    %c0 = arith.constant 0 : index
    %c0_0 = arith.constant 0 : index
    %c0_1 = arith.constant 0 : index
    %0 = vector.load %arg2[%c0, %c0_0, %c0_1] : memref<1x8x32xbf16, #tpu.memory_space<vmem>>, vector<1x8x32xbf16>
    %1 = vector.shape_cast %0 : vector<1x8x32xbf16> to vector<8x32xbf16>
    %c0_2 = arith.constant 0 : index
    %c0_3 = arith.constant 0 : index
    %c0_4 = arith.constant 0 : index
    %2 = vector.load %arg3[%c0_2, %c0_3, %c0_4] : memref<1x32x8xbf16, #tpu.memory_space<vmem>>, vector<1x32x8xbf16>
    %3 = vector.shape_cast %2 : vector<1x32x8xbf16> to vector<32x8xbf16>
    %cst = arith.constant dense<0.000000e+00> : vector<8x8xf32>
    %4 = tpu.matmul %1, %3, %cst {dimension_numbers = #tpu.dot_dimension_numbers<[1], [0], [0], [1], [0, 0, 1, 1], [], []>} : vector<8x32xbf16>, vector<32x8xbf16>, vector<8x8xf32> -> vector<8x8xf32>
    %c0_5 = arith.constant 0 : index
    %c0_6 = arith.constant 0 : index
    %c0_7 = arith.constant 0 : index
    %5 = vector.load %arg6[%c0_5, %c0_6, %c0_7] : memref<1x1x8xf32, #tpu.memory_space<vmem>>, vector<1x1x8xf32>
    %6 = vector.shape_cast %5 : vector<1x1x8xf32> to vector<1x8xf32>
    %7 = vector.broadcast %6 : vector<1x8xf32> to vector<8x8xf32>
    %8 = arith.addf %4, %7 : vector<8x8xf32>
    %c0_8 = arith.constant 0 : index
    %c0_9 = arith.constant 0 : index
    %c0_10 = arith.constant 0 : index
    %9 = vector.load %arg4[%c0_8, %c0_9, %c0_10] : memref<1x32x8xbf16, #tpu.memory_space<vmem>>, vector<1x32x8xbf16>
    %10 = vector.shape_cast %9 : vector<1x32x8xbf16> to vector<32x8xbf16>
    %cst_11 = arith.constant dense<0.000000e+00> : vector<8x8xf32>
    %11 = tpu.matmul %1, %10, %cst_11 {dimension_numbers = #tpu.dot_dimension_numbers<[1], [0], [0], [1], [0, 0, 1, 1], [], []>} : vector<8x32xbf16>, vector<32x8xbf16>, vector<8x8xf32> -> vector<8x8xf32>
    %c0_12 = arith.constant 0 : index
    %c0_13 = arith.constant 0 : index
    %c0_14 = arith.constant 0 : index
    %12 = vector.load %arg7[%c0_12, %c0_13, %c0_14] : memref<1x1x8xf32, #tpu.memory_space<vmem>>, vector<1x1x8xf32>
    %13 = vector.shape_cast %12 : vector<1x1x8xf32> to vector<1x8xf32>
    %14 = vector.broadcast %13 : vector<1x8xf32> to vector<8x8xf32>
    %15 = arith.addf %11, %14 : vector<8x8xf32>
    %c0_15 = arith.constant 0 : index
    %c0_16 = arith.constant 0 : index
    %c0_17 = arith.constant 0 : index
    %16 = vector.load %arg5[%c0_15, %c0_16, %c0_17] : memref<1x32x8xbf16, #tpu.memory_space<vmem>>, vector<1x32x8xbf16>
    %17 = vector.shape_cast %16 : vector<1x32x8xbf16> to vector<32x8xbf16>
    %cst_18 = arith.constant dense<0.000000e+00> : vector<8x8xf32>
    %18 = tpu.matmul %1, %17, %cst_18 {dimension_numbers = #tpu.dot_dimension_numbers<[1], [0], [0], [1], [0, 0, 1, 1], [], []>} : vector<8x32xbf16>, vector<32x8xbf16>, vector<8x8xf32> -> vector<8x8xf32>
    %c0_19 = arith.constant 0 : index
    %c0_20 = arith.constant 0 : index
    %c0_21 = arith.constant 0 : index
    %19 = vector.load %arg8[%c0_19, %c0_20, %c0_21] : memref<1x1x8xf32, #tpu.memory_space<vmem>>, vector<1x1x8xf32>
    %20 = vector.shape_cast %19 : vector<1x1x8xf32> to vector<1x8xf32>
    %21 = vector.broadcast %20 : vector<1x8xf32> to vector<8x8xf32>
    %22 = arith.addf %18, %21 : vector<8x8xf32>
    %23 = arith.truncf %8 : vector<8x8xf32> to vector<8x8xbf16>
    %c0_22 = arith.constant 0 : index
    %c0_23 = arith.constant 0 : index
    %c0_24 = arith.constant 0 : index
    %c0_25 = arith.constant 0 : index
    %24 = vector.load %arg9[%c0_22, %c0_23, %c0_24, %c0_25] : memref<1x1x8x8xbf16, #tpu.memory_space<vmem>>, vector<1x1x8x8xbf16>
    %25 = vector.shape_cast %24 : vector<1x1x8x8xbf16> to vector<8x8xbf16>
    %26 = vector.shape_cast %23 : vector<8x8xbf16> to vector<1x1x8x8xbf16>
    tpu.vector_store %arg9[%c0_22, %c0_23, %c0_24, %c0_25], %26 {strides = array<i32>} : memref<1x1x8x8xbf16, #tpu.memory_space<vmem>>, vector<1x1x8x8xbf16>,
    %27 = arith.truncf %15 : vector<8x8xf32> to vector<8x8xbf16>
    %c0_26 = arith.constant 0 : index
    %c0_27 = arith.constant 0 : index
    %c0_28 = arith.constant 0 : index
    %c0_29 = arith.constant 0 : index
    %28 = vector.load %arg10[%c0_26, %c0_27, %c0_28, %c0_29] : memref<1x1x8x8xbf16, #tpu.memory_space<vmem>>, vector<1x1x8x8xbf16>
    %29 = vector.shape_cast %28 : vector<1x1x8x8xbf16> to vector<8x8xbf16>
    %30 = vector.shape_cast %27 : vector<8x8xbf16> to vector<1x1x8x8xbf16>
    tpu.vector_store %arg10[%c0_26, %c0_27, %c0_28, %c0_29], %30 {strides = array<i32>} : memref<1x1x8x8xbf16, #tpu.memory_space<vmem>>, vector<1x1x8x8xbf16>,
    %31 = arith.truncf %22 : vector<8x8xf32> to vector<8x8xbf16>
    %c0_30 = arith.constant 0 : index
    %c0_31 = arith.constant 0 : index
    %c0_32 = arith.constant 0 : index
    %c0_33 = arith.constant 0 : index
    %32 = vector.load %arg11[%c0_30, %c0_31, %c0_32, %c0_33] : memref<1x1x8x8xbf16, #tpu.memory_space<vmem>>, vector<1x1x8x8xbf16>
    %33 = vector.shape_cast %32 : vector<1x1x8x8xbf16> to vector<8x8xbf16>
    %34 = vector.shape_cast %31 : vector<8x8xbf16> to vector<1x1x8x8xbf16>
    tpu.vector_store %arg11[%c0_30, %c0_31, %c0_32, %c0_33], %34 {strides = array<i32>} : memref<1x1x8x8xbf16, #tpu.memory_space<vmem>>, vector<1x1x8x8xbf16>,
    return
  }
  func.func @transform_0(%arg0: i32, %arg1: i32) -> (i32, i32, i32) {
    %c0_i32 = arith.constant 0 : i32
    %c0_i32_0 = arith.constant 0 : i32
    %c0_i32_1 = arith.constant 0 : i32
    return %arg0, %c0_i32, %c0_i32_0 : i32, i32, i32
  }
  func.func @transform_1(%arg0: i32, %arg1: i32) -> (i32, i32, i32) {
    %c0_i32 = arith.constant 0 : i32
    %c0_i32_0 = arith.constant 0 : i32
    %c0_i32_1 = arith.constant 0 : i32
    return %arg1, %c0_i32, %c0_i32_0 : i32, i32, i32
  }
  func.func @transform_2(%arg0: i32, %arg1: i32) -> (i32, i32, i32) {
    %c0_i32 = arith.constant 0 : i32
    %c0_i32_0 = arith.constant 0 : i32
    %c0_i32_1 = arith.constant 0 : i32
    return %arg1, %c0_i32, %c0_i32_0 : i32, i32, i32
  }
  func.func @transform_3(%arg0: i32, %arg1: i32) -> (i32, i32, i32) {
    %c0_i32 = arith.constant 0 : i32
    %c0_i32_0 = arith.constant 0 : i32
    %c0_i32_1 = arith.constant 0 : i32
    return %arg1, %c0_i32, %c0_i32_0 : i32, i32, i32
  }
  func.func @transform_4(%arg0: i32, %arg1: i32) -> (i32, i32, i32) {
    %c0_i32 = arith.constant 0 : i32
    %c0_i32_0 = arith.constant 0 : i32
    %c0_i32_1 = arith.constant 0 : i32
    return %arg1, %c0_i32, %c0_i32_0 : i32, i32, i32
  }
  func.func @transform_5(%arg0: i32, %arg1: i32) -> (i32, i32, i32) {
    %c0_i32 = arith.constant 0 : i32
    %c0_i32_0 = arith.constant 0 : i32
    %c0_i32_1 = arith.constant 0 : i32
    return %arg1, %c0_i32, %c0_i32_0 : i32, i32, i32
  }
  func.func @transform_6(%arg0: i32, %arg1: i32) -> (i32, i32, i32) {
    %c0_i32 = arith.constant 0 : i32
    %c0_i32_0 = arith.constant 0 : i32
    %c0_i32_1 = arith.constant 0 : i32
    return %arg1, %c0_i32, %c0_i32_0 : i32, i32, i32
  }
  func.func @transform_7(%arg0: i32, %arg1: i32) -> (i32, i32, i32, i32) {
    %c0_i32 = arith.constant 0 : i32
    %c0_i32_0 = arith.constant 0 : i32
    %c0_i32_1 = arith.constant 0 : i32
    return %arg0, %arg1, %c0_i32, %c0_i32_0 : i32, i32, i32, i32
  }
  func.func @transform_8(%arg0: i32, %arg1: i32) -> (i32, i32, i32, i32) {
    %c0_i32 = arith.constant 0 : i32
    %c0_i32_0 = arith.constant 0 : i32
    %c0_i32_1 = arith.constant 0 : i32
    return %arg0, %arg1, %c0_i32, %c0_i32_0 : i32, i32, i32, i32
  }
  func.func @transform_9(%arg0: i32, %arg1: i32) -> (i32, i32, i32, i32) {
    %c0_i32 = arith.constant 0 : i32
    %c0_i32_0 = arith.constant 0 : i32
    %c0_i32_1 = arith.constant 0 : i32
    return %arg0, %arg1, %c0_i32, %c0_i32_0 : i32, i32, i32, i32
  }
}

</mosaic_0001>

<bundles_post_ra>
// kernel: tpu_custom_call.1
= control target key start
LH: loop header
LB: loop body
LE: loop exit
PB: predicated region body
PF: predicated region fallthrough
CT: control target
= control target key end

     0   :  { %15 = vsyncpa [#allocation3], 0  ;;  %s1555_s0 = inlined_call_operand.vmem [shape: bf16[2,8,32], index: 0, kind: input, shape index: {}]   ;;  %s1556_s1 = inlined_call_operand.vmem [shape: bf16[4,32,8], index: 1, kind: input, shape index: {}]   ;;  %s1557_s2 = inlined_call_operand.vmem [shape: bf16[4,32,8], index: 2, kind: input, shape index: {}]   ;;  %s1558_s3 = inlined_call_operand.vmem [shape: bf16[4,32,8], index: 3, kind: input, shape index: {}]   ;;  %s1559_s4 = inlined_call_operand.vmem [shape: f32[4,1,8], index: 4, kind: input, shape index: {}]   ;;  %s1560_s5 = inlined_call_operand.vmem [shape: f32[4,1,8], index: 5, kind: input, shape index: {}]   ;;  %s1561_s6 = inlined_call_operand.vmem [shape: f32[4,1,8], index: 6, kind: input, shape index: {}]   ;;  %s1562_s7 = inlined_call_operand.hbm [shape: bf16[2,4,8,8], index: 7, kind: output, shape index: {0}]   ;;  %s1563_s8 = inlined_call_operand.hbm [shape: bf16[2,4,8,8], index: 8, kind: output, shape index: {1}]   ;;  %s1564_s9 = inlined_call_operand.hbm [shape: bf16[2,4,8,8], index: 9, kind: output, shape index: {2}]  }
   0x1   :  { %17 = vsyncpa [#allocation3 + $0x1], 0 }
   0x2   :  { %18 = vsyncpa [#allocation5], 0 }
   0x3   :  { %20 = vsyncpa [#allocation5 + $0x1], 0  ;;  %s1298_s30 = smov 0   ;;  %s1300_s10 = smov 0  }
   0x4   :  { %s1302_s11 = smov 0   ;;  %s1304_s12 = smov 0  }
   0x5   :  { %s1306_s13 = smov 0   ;;  %s1308_s14 = smov 0  }
   0x6   :  { %s1310_s15 = smov 0   ;;  %s1312_s16 = smov 0  }
   0x7 LB: > { %1574 = sst [smem:[#allocation9_spill]] %s1213_s30  ;;  %s1566_s17 = sadd.s32 4294967295, %s1241_s16   ;;  %s1241_s16 = sphi %s1312_s16, %s26_s16   ;;  %s1237_s15 = sphi %s1310_s15, %s1593_s15   ;;  %s1233_s14 = sphi %s1308_s14, %s1592_s14   ;;  %s1229_s13 = sphi %s1306_s13, %s1591_s13   ;;  %s1225_s12 = sphi %s1304_s12, %s1590_s12   ;;  %s1221_s11 = sphi %s1302_s11, %s1589_s11   ;;  %s1217_s10 = sphi %s1300_s10, %s1595_s10   ;;  %s1213_s30 = sphi %s1298_s30, %s1594_s30  }
   0x8   : > { %1575 = sst [smem:[#allocation10_spill]] %s1221_s11  ;;  %s1565_s18 = sadd.s32 4294967294, %s1241_s16  }
   0x9   : > { %1576 = sst [smem:[#allocation11_spill]] %s1233_s14  ;;  %s35_s19 = sadd.s32 1, %s1233_s14 }
   0xa   : > { %1577 = sst [smem:[#allocation12_spill]] %s1237_s15  ;;  %p36_p0 = scmp.ge.s32.totalorder %s35_s19, 4 }
   0xb   : > { %s38_s20 = sadd.s32 1, %s1237_s15  ;;  %p239_p1 = scmp.ne.s32.totalorder %s1221_s11, %s1217_s10 }
   0xc   : > { %p240_p2 = scmp.eq.s32.totalorder %s1566_s17, 7  ;;  %s1597_s19 = smov (%p36_p0, %s35_s19), 0 }
   0xd   : > { %1578 = sst [smem:[#allocation13_spill]] %s1597_s19  ;;  %s1599_s20 = smov (!%p36_p0, %s38_s20), %s1237_s15 }
   0xe   : > { %s225_s21 = ssub.s32 %s1233_s14, %s1597_s19  ;;  %p1351_p3 = por %p240_p2, %p239_p1 }
   0xf   : > { %p40_p4 = scmp.ge.s32.totalorder %s1599_s20, 2  ;;  %p245_p5 = scmp.ne.s32.totalorder %s1217_s10, %s1213_s30 }
  0x10   : > { %p246_p6 = scmp.eq.s32.totalorder %s1565_s18, 7  ;;  %p928_p7 = scmp.ge.s32.totalorder %s1241_s16, 1 }
  0x11   : > { %s1601_s20 = smov (%p40_p4, %s1599_s20), 0  ;;  %p369_p9 = scmp.lt.s32.totalorder %s1241_s16, 9 }
  0x12   : > { %1580 = sst [smem:[#allocation14_spill]] %s1601_s20  ;;  %p1362_p8 = por %p246_p6, %p245_p5 }
  0x13   : > { %s224_s24 = ssub.s32 %s1237_s15, %s1601_s20  ;;  %s229_s25 = sadd.s32 1, %s1221_s11 }
  0x14   : > { %s1581_s23 = scalar_select %p1362_p8, 1, 0 }
  0x15   : > { %s226_s26 = sor.u32 %s225_s21, %s224_s24  ;;  %p370_p10 = pnand %p928_p7, %p369_p9 }
  0x16   : > { %1582 = sst [smem:[#allocation15_spill]] %s1581_s23  ;;  %p227_p11 = scmp.eq.s32.totalorder %s226_s26, 0  ;;  %v1243_v0 = vmov (!%p370_p10), 0.0   ;;  %vm1244_vm0 = vmmov (!%p370_p10), 0   ;;  %vm491_vm1 = vcmask (!%p370_p10), 261120   ;;  %vm662_vm2 = vcmask (!%p370_p10), 60416  }
  0x17   : > { %373 = sbr.rel (%p370_p10) target bundleno = 319 (0x13f), region = 48  ;;  %p442_p12 = scmp.lt.s32.totalorder (!%p370_p10), %s1225_s12, 3  ;;  %974 = vmatprep.subr.bf16.mxu0 (!%p370_p10), %v1243_v0  ;;  %982 = vmatprep.subr.bf16.mxu1 (!%p370_p10), %v1243_v0 }
  0x18   : > { %s1371_s27 = scalar_select %p227_p11, %s1221_s11, %s229_s25  }
  0x19   : > { %p438_p13 = scmp.lt.s32.totalorder (!%p370_p10), %s1229_s13, 1  ;;  %978 = vmatprep.mubr.msk.bf16.mxu0 (!%p370_p10), %vm1244_vm0, %v1243_v0  ;;  %986 = vmatprep.mubr.msk.bf16.mxu1 (!%p370_p10), %vm1244_vm0, %v1243_v0  ;;  %s421_s11 = sand.u32 (!%p370_p10), 1, %s1217_s10  }
  0x1a   : > { %1583 = sst [smem:[#allocation16_spill]] %s1371_s27  ;;  %s1403_s18 = sshll.u32 (!%p370_p10), %s421_s11, 2 }
  0x1b   : > { %s1584_s14 = sadd.s32 (!%p370_p10), 4294967295, %s1241_s16   ;;  %s669_s24 = scalar_lea.sflag (!%p370_p10), [#allocation3], %s421_s11 }
  0x1c   : > { %s1419_s15 = sand.u32 (!%p370_p10), 1, %s1584_s14   ;;  %s1245_s14 = smov (!%p370_p10), [#allocation2]  }
  0x1e   : > { %s1376_s28 = scalar_select %p442_p12, %s1225_s12, 3 }
  0x1f   : > { %s439_s29 = scalar_select %p438_p13, %s1229_s13, 1 }
  0x20   : > { %s962_s21 = sshll.u32 %s1376_s28, 4  ;;  %s459_s17 = scalar_lea.vmem %s1559_s4, %s1376_s28 }
  0x21   : > { %s446_s26 = scalar_lea.vmem %s1556_s1, %s962_s21  ;;  %s451_s20 = scalar_lea.vmem %s1557_s2, %s962_s21  ;;  %v939_v8 = vld [vmem:[%s459_s17] ss:$0 sm:$0xff] }
  0x22   : > { %v1081_v1 = vld [vmem:[%s446_s26] sm:$0xff]   ;;  %s932_s19 = sshll.u32 %s439_s29, 2  ;;  %v1082_v2 = vld [vmem:[%s446_s26 + $0x8] sm:$0xff]   ;;  %s456_s27 = scalar_lea.vmem %s1558_s3, %s962_s21 }
  0x23   : > { %975 = vmatpush3.bf16.msra.mxu0 %v1081_v1  ;;  %v1083_v3 = vld [vmem:[%s451_s20] sm:$0xff]   ;;  %s441_s30 = scalar_lea.vmem %s1555_s0, %s932_s19  ;;  %v1085_v4 = vld [vmem:[%s451_s20 + $0x8] sm:$0xff]   ;;  %s462_s23 = scalar_lea.vmem %s1560_s5, %s1376_s28 }
  0x24   : > { %976 = vmatprep.subr.bf16.mxu0 %v1243_v0  ;;  %983 = vmatpush3.bf16.msra.mxu1 %v1083_v3  ;;  %v467_v5 = vld [vmem:[%s441_s30] sm:$0xf]  ;;  %v1086_v7 = vld [vmem:[%s456_s27 + $0x8] sm:$0xff]   ;;  %s954_s30 = sshll.u32 %s1229_s13, 2  ;;  %s423_s13 = scalar_lea.vmem [#allocation2], %s1403_s18 }
  0x25   : > { %984 = vmatprep.subr.bf16.mxu1 %v1243_v0  ;;  %v1084_v6 = vld [vmem:[%s456_s27] sm:$0xff]   ;;  %s690_s27 = sadd.s32 %s1225_s12, %s954_s30  ;;  %s694_s21 = sshll.u32 %s423_s13, 4  ;;  %s1430_s21 = int_to_ptr.vmem [resolvable:$true] %s694_s21 }
  0x26   : > { %v943_v10 = vld [vmem:[%s462_s23] ss:$0 sm:$0xff]  ;;  %s1410_s29 = sshll.u32 %s690_s27, 6  ;;  %s465_s26 = scalar_lea.vmem %s1561_s6, %s1376_s28 }
  0x27   : > { %977 = vmatpush3.bf16.msra.mxu0 %v1082_v2  ;;  %s430_s12 = scalar_lea.vmem [#allocation4], %s1403_s18  ;;  %s1428_s28 = scalar_lea.hbm %s1562_s7, %s1410_s29  ;;  %v947_v22 = vld [vmem:[%s465_s26] ss:$0 sm:$0xff] }
  0x28   : > { %990 = vmatprep.subr.bf16.mxu0 %v1243_v0  ;;  %985 = vmatpush3.bf16.msra.mxu1 %v1085_v4  ;;  %s709_s30 = sshll.u32 %s430_s12, 4  ;;  %s1436_s27 = scalar_lea.hbm %s1563_s8, %s1410_s29  ;;  %s1438_s30 = int_to_ptr.vmem [resolvable:$true] %s709_s30 }
  0x29   : > { %s1087_s25 = scalar_lea.vmem %s1430_s21, 64  ;;  %s1091_s17 = sshll.u32 %s1245_s14, 4  ;;  %s1092_s17 = int_to_ptr.vmem [resolvable:$false] %s1091_s17 }
  0x2a   : > { %979 = vmatmul.mubr.msk.bf16.vlgmr.msra.gmra.mrb[0].mxu0 %vm491_vm1, %v467_v5  ;;  %p1088_p0 = scmp.ne.s32.totalorder %s1430_s21, %s1087_s25  ;;  %s1093_s19 = scalar_lea.vmem %s1092_s17, 128 }
  0x2b   : > { %991 = vmatpush3.bf16.msra.mxu0 %v1084_v6  ;;  %994 = vmatprep.mubr.msk.bf16.mxu0 %vm1244_vm0, %v1243_v0  ;;  %p1094_p4 = scmp.lt.s32.totalorder %s1430_s21, %s1092_s17  ;;  %p1095_p5 = scmp.lt.s32.totalorder %s1093_s19, %s1087_s25 }
  0x2c   : > { %992 = vmatprep.subr.bf16.mxu0 %v1243_v0  ;;  %987 = vmatmul.mubr.msk.bf16.vlgmr.msra.gmra.mrb[0].mxu1 %vm491_vm1, %v467_v5  ;;  %p1089_p1 = pnand %p1088_p0, %p1351_p3 }
  0x2d   : > { %p1096_p6 = por %p1095_p5, %p1094_p4 }
  0x2e   : > { %p1090_p2 = pneg %p1089_p1 }
  0x2f   : > { %993 = vmatpush3.bf16.msra.mxu0 %v1086_v7 }
  0x30   : > { %p1097_p7 = pnand %p1096_p6, %p1090_p2 }
  0x32   : > { %995 = vmatmul.mubr.msk.bf16.vlgmr.msra.gmra.mrb[4].mxu0 %vm491_vm1, %v467_v5 }
  0xfd   : > { %v529_v9 = vpop.f32.mrb[0].mxu0 }
  0xfe   : > { %v530_v11 = vadd.f32 %v939_v8, %v529_v9  ;;  %v980_v12 = vpop.f32.mrb[1].mxu0 }
  0xff   : > { %v532_v13 = vpop.f32.mrb[2].mxu0  ;;  %v592_v14 = vpop.f32.mrb[0].mxu1 }
 0x100   : > { %v661_v15 = vpack.c.bf16 %v530_v11, %v530_v11  ;;  %v981_v16 = vpop.f32.mrb[3].mxu0  ;;  %v593_v17 = vadd.f32 %v943_v10, %v592_v14  ;;  %v988_v18 = vpop.f32.mrb[1].mxu1 }
 0x101   : > { %v595_v19 = vpop.f32.mrb[2].mxu1 }
 0x102   : > { %v664_v20 = vpack.c.bf16 %v593_v17, %v593_v17  ;;  %v989_v21 = vpop.f32.mrb[3].mxu1  ;;  %663 = vst.msk [vmem:[%s423_s13] sm:$0xf] %vm662_vm2, %v661_v15 }
 0x103   : > { %1100 = shalt.err (!%p1097_p7)
}
 0x104   : > { %s1101_s11 = scalar_lea.hbm %s1428_s28, 64  ;;  %s1105_s20 = scalar_lea.hbm %s1562_s7, 512 }
 0x105   : > { %p1102_p9 = scmp.ne.s32.totalorder %s1428_s28, %s1101_s11  ;;  %p1106_p12 = scmp.lt.u32.totalorder %s1428_s28, %s1562_s7 }
 0x106   : > { %p1107_p13 = scmp.lt.u32.totalorder %s1105_s20, %s1101_s11  ;;  %p1109_p1 = scmp.lt.u32.totalorder %s1101_s11, %s1428_s28 }
 0x107   : > { %p1103_p10 = pnand %p1102_p9, %p1351_p3 }
 0x108   : > { %p1108_p0 = por %p1107_p13, %p1106_p12 }
 0x109   : > { %p1104_p11 = pneg %p1103_p10 }
 0x10a   : > { %p1110_p2 = por %p1109_p1, %p1108_p0 }
 0x10c   : > { %p1111_p4 = pnand %p1110_p2, %p1104_p11 }
 0x10e   : > { %1114 = shalt.err (!%p1111_p4)
}
 0x10f   : > { %998 = dma.vmem_to_hbm [thread:$0]  (%p1351_p3), %s1430_s21, 64, %s1428_s28, %s669_s24   ;;  %665 = vst.msk [vmem:[%s430_s12] sm:$0xf] %vm662_vm2, %v664_v20  ;;  %v655_v23 = vpop.f32.mrb[4].mxu0 }
 0x110   : > { %s437_s25 = scalar_lea.vmem [#allocation6], %s1403_s18  ;;  %s674_s19 = scalar_lea.sflag [#allocation5], %s1419_s15 }
 0x111   : > { %s1470_s17 = sshll.u32 %s437_s25, 4  ;;  %s1115_s11 = scalar_lea.vmem %s1438_s30, 64  ;;  %s725_s17 = int_to_ptr.vmem [resolvable:$true] %s1470_s17 }
 0x112   : > { %p1116_p5 = scmp.ne.s32.totalorder %s1438_s30, %s1115_s11  ;;  %s1246_s13 = smov [#allocation4]  }
 0x113   : > { %s1119_s26 = sshll.u32 %s1246_s13, 4  ;;  %s1120_s26 = int_to_ptr.vmem [resolvable:$false] %s1119_s26 }
 0x114   : > { %p1117_p6 = pnand %p1116_p5, %p1351_p3  ;;  %s1121_s20 = scalar_lea.vmem %s1120_s26, 128 }
 0x115   : > { %p1122_p9 = scmp.lt.s32.totalorder %s1438_s30, %s1120_s26  ;;  %p1123_p10 = scmp.lt.s32.totalorder %s1121_s20, %s1115_s11 }
 0x116   : > { %p1118_p7 = pneg %p1117_p6 }
 0x117   : > { %p1124_p11 = por %p1123_p10, %p1122_p9 }
 0x119   : > { %p1125_p12 = pnand %p1124_p11, %p1118_p7 }
 0x11b   : > { %1128 = shalt.err (!%p1125_p12)
}
 0x11c   : > { %s1129_s21 = scalar_lea.hbm %s1436_s27, 64  ;;  %s1133_s24 = scalar_lea.hbm %s1563_s8, 512 }
 0x11d   : > { %p1130_p13 = scmp.ne.s32.totalorder %s1436_s27, %s1129_s21  ;;  %p1134_p2 = scmp.lt.u32.totalorder %s1436_s27, %s1563_s8 }
 0x11e   : > { %p1135_p4 = scmp.lt.u32.totalorder %s1133_s24, %s1129_s21  ;;  %p1137_p6 = scmp.lt.u32.totalorder %s1129_s21, %s1436_s27 }
 0x11f   : > { %p1131_p0 = pnand %p1130_p13, %p1351_p3 }
 0x120   : > { %p1136_p5 = por %p1135_p4, %p1134_p2 }
 0x121   : > { %p1132_p1 = pneg %p1131_p0 }
 0x122   : > { %p1138_p7 = por %p1137_p6, %p1136_p5 }
 0x124   : > { %p1139_p9 = pnand %p1138_p7, %p1132_p1 }
 0x126   : > { %1142 = shalt.err (!%p1139_p9)
}
 0x127   : > { %999 = dma.vmem_to_hbm [thread:$0]  (%p1351_p3), %s1438_s30, 64, %s1436_s27, %s674_s19   ;;  %v656_v24 = vadd.f32 %v947_v22, %v655_v23  ;;  %v996_v25 = vpop.f32.mrb[5].mxu0 }
 0x128   : > { %v658_v26 = vpop.f32.mrb[6].mxu0  ;;  %s1500_s26 = scalar_lea.hbm %s1564_s9, %s1410_s29  ;;  %s1143_s20 = scalar_lea.vmem %s725_s17, 64 }
 0x129   : > { %v666_v27 = vpack.c.bf16 %v656_v24, %v656_v24  ;;  %v997_v28 = vpop.f32.mrb[7].mxu0  ;;  %p1144_p10 = scmp.ne.s32.totalorder %s725_s17, %s1143_s20  ;;  %s1247_s30 = smov [#allocation6]  }
 0x12a   : > { %s1147_s27 = sshll.u32 %s1247_s30, 4  ;;  %s1148_s27 = int_to_ptr.vmem [resolvable:$false] %s1147_s27 }
 0x12b   : > { %667 = vst.msk [vmem:[%s437_s25] sm:$0xf] %vm662_vm2, %v666_v27  ;;  %p1145_p11 = pnand %p1144_p10, %p1351_p3  ;;  %s1149_s21 = scalar_lea.vmem %s1148_s27, 128 }
 0x12c   : > { %p1150_p13 = scmp.lt.s32.totalorder %s725_s17, %s1148_s27  ;;  %p1151_p0 = scmp.lt.s32.totalorder %s1149_s21, %s1143_s20 }
 0x12d   : > { %p1146_p12 = pneg %p1145_p11 }
 0x12e   : > { %p1152_p1 = por %p1151_p0, %p1150_p13 }
 0x130   : > { %p1153_p2 = pnand %p1152_p1, %p1146_p12 }
 0x132   : > { %1156 = shalt.err (!%p1153_p2)
}
 0x133   : > { %s1157_s18 = scalar_lea.hbm %s1500_s26, 64  ;;  %s1161_s12 = scalar_lea.hbm %s1564_s9, 512 }
 0x134   : > { %p1158_p4 = scmp.ne.s32.totalorder %s1500_s26, %s1157_s18  ;;  %p1162_p7 = scmp.lt.u32.totalorder %s1500_s26, %s1564_s9 }
 0x135   : > { %p1163_p9 = scmp.lt.u32.totalorder %s1161_s12, %s1157_s18  ;;  %p1165_p11 = scmp.lt.u32.totalorder %s1157_s18, %s1500_s26 }
 0x136   : > { %p1159_p5 = pnand %p1158_p4, %p1351_p3 }
 0x137   : > { %p1164_p10 = por %p1163_p9, %p1162_p7 }
 0x138   : > { %p1160_p6 = pneg %p1159_p5 }
 0x139   : > { %p1166_p12 = por %p1165_p11, %p1164_p10 }
 0x13b   : > { %p1167_p13 = pnand %p1166_p12, %p1160_p6 }
 0x13d   : > { %1170 = shalt.err (!%p1167_p13)
}
 0x13e   : > { %1000 = dma.vmem_to_hbm [thread:$0]  (%p1351_p3), %s725_s17, 64, %s1500_s26, %s674_s19  }
 0x13f PF: > { %s1585_s23 = sld [smem:[#allocation9_spill]]  ;;  %p1014_p0 = scmp.ge.s32.totalorder %s1241_s16, 2 }
 0x141   : > { %p1005_p1 = pnand %p1014_p0, %p1362_p8 }
 0x145   : > { %s736_s11 = sand.u32 1, %s1585_s23  }
 0x146   : > { %s737_s13 = scalar_lea.sflag [#allocation3], %s736_s11 }
 0x147   : > { %1204 = dma.done.wait (!%p1005_p1), %s737_s13, 64  }
 0x148   : > { %1206 = vsyncadd (!%p1005_p1), %s737_s13, 4294967232  ;;  %s1587_s20 = sadd.s32 4294967294, %s1241_s16  }
 0x149   : > { %s745_s30 = sand.u32 1, %s1587_s20  }
 0x14a   : > { %s746_s27 = scalar_lea.sflag [#allocation5], %s745_s30 }
 0x14b   : > { %1208 = dma.done.wait (!%p1005_p1), %s746_s27, 128  }
 0x14c   : > { %1210 = vsyncadd (!%p1005_p1), %s746_s27, 4294967168  ;;  %s26_s16 = sadd.s32 1, %s1241_s16   ;;  %s1588_s22 = sld [smem:[#allocation10_spill]] }
 0x14d   : > { %p23_p3 = scmp.ge.s32.totalorder %s26_s16, 10   ;;  %s1589_s11 = sld [smem:[#allocation16_spill]] }
 0x14e   : > { %s1590_s12 = sld [smem:[#allocation11_spill]]  ;;  %s1591_s13 = sld [smem:[#allocation12_spill]] }
 0x14f   : > { %s1592_s14 = sld [smem:[#allocation13_spill]]  ;;  %s1593_s15 = sld [smem:[#allocation14_spill]] }
 0x150   : > { %s1594_s30 = smov %s1217_s10  ;;  %25 = sbr.rel (!%p23_p3) target bundleno = 7 (0x7), region = 133 }
 0x152   : > { %s1595_s10 = smov %s1588_s22 }
 0x157   :  { %760 = vsyncpa [#allocation3], 1 }
 0x158   :  { %762 = vsyncpa [#allocation3 + $0x1], 1 }
 0x159   :  { %763 = vsyncpa [#allocation5], 1 }
 0x15a   :  { %765 = vsyncpa [#allocation5 + $0x1], 1 }

</bundles_post_ra>
